<compile_context>
chip_gen: v6e
topology: v6e:2x2x1
jax: 0.10.0
libtpu: 0.0.40
codegen_flags: <defaults>
</compile_context>

<pallas_src>
import functools

import jax
import jax.numpy as jnp
from jax.experimental import pallas as pl
from jax.experimental.pallas import tpu as pltpu

EPS = 1e-5


def _conv_stats_kernel(x0_ref, x1_ref, w_ref, y_ref, sum_ref, ssq_ref, *, wo):
    """Conv tile (4 shifted bf16 matmuls, f32 acc) + per-tile BN partial stats."""
    tr = x0_ref.shape[0]
    kc = x0_ref.shape[2]
    acc = None
    taps = ((x0_ref, 0), (x0_ref, 1), (x1_ref, 0), (x1_ref, 1))
    for wi, (x_ref, dw) in enumerate(taps):
        lhs = x_ref[:, dw:dw + wo, :].reshape(tr * wo, kc)            # bf16
        part = jnp.dot(lhs, w_ref[wi], preferred_element_type=jnp.float32)
        acc = part if acc is None else acc + part
    y_ref[...] = acc                                                  # f32 [tr*wo, Cp]
    sum_ref[...] = jnp.sum(acc, axis=0, keepdims=True)                # [1, Cp]
    ssq_ref[...] = jnp.sum(acc * acc, axis=0, keepdims=True)          # [1, Cp]


def _bn_relu_kernel(y_ref, sum_ref, ssq_ref, gamma_ref, beta_ref, o_ref, *, inv_m):
    """Finalize BN stats (f32, clamped biased var), apply scale/shift + ReLU."""
    s = jnp.sum(sum_ref[...], axis=0, keepdims=True)                  # [1, Cp]
    ss = jnp.sum(ssq_ref[...], axis=0, keepdims=True)
    mean = s * inv_m
    var = jnp.maximum(ss * inv_m - mean * mean, 0.0)                  # biased var
    scale = gamma_ref[...] * jax.lax.rsqrt(var + EPS)
    shift = beta_ref[...] - mean * scale
    o_ref[...] = jnp.maximum(y_ref[...] * scale + shift, 0.0)


def _round_up(v, m):
    return (v + m - 1) // m * m


def _pick_row_tile(bho, wo, max_rows=1024):
    """Largest divisor of bho giving <= max_rows (8-aligned) output rows per tile."""
    divs = [d for d in range(1, bho + 1) if bho % d == 0]
    ok = [d for d in divs if (d * wo) % 8 == 0]
    fit = [d for d in ok if d * wo <= max_rows]
    if fit:
        return max(fit)
    if ok:
        return min(ok)
    return bho


def gen_block_forward(x, weight, gamma, beta):
    """x: [B, Cin, H, W] f32 (NCHW); weight: [Cout, Cin, 4, 4]; returns NCHW."""
    B, Cin, H, W = x.shape
    Cout = weight.shape[0]
    assert weight.shape == (Cout, Cin, 4, 4)
    assert H % 2 == 0 and W % 2 == 0, "even spatial dims required"

    Ho, Wo = H // 2, W // 2
    Hh, Wh = Ho + 1, Wo + 1          # space-to-depth grid of the padded input
    Kc = 4 * Cin                     # channels after 2x2 space-to-depth
    Cp = _round_up(Cout, 128)        # lane-dense output channels
    BHo = B * Ho
    M = BHo * Wo                     # number of output pixels (BN batch size)

    # ---- wrapper glue: NHWC, reflect pad, 2x2 space-to-depth, bf16 cast ----
    x_nhwc = jnp.transpose(x, (0, 2, 3, 1))
    xp = jnp.pad(x_nhwc, ((0, 0), (1, 1), (1, 1), (0, 0)), mode="reflect")
    xp = xp.astype(jnp.bfloat16)
    xs = xp.reshape(B, Hh, 2, Wh, 2, Cin)
    xs = jnp.transpose(xs, (0, 1, 3, 2, 4, 5)).reshape(B, Hh, Wh, Kc)
    # Two row-shifted views (dh = 0 / 1); the dw shift is done inside the kernel.
    xs0 = xs[:, :Ho].reshape(BHo, Wh, Kc)
    xs1 = xs[:, 1:].reshape(BHo, Wh, Kc)

    # Weights -> 4 taps [4, Kc, Cp]; tap index = 2*dh + dw, K order = (ph, pw, c).
    w_r = weight.astype(jnp.float32).reshape(Cout, Cin, 2, 2, 2, 2)   # o,c,dh,ph,dw,pw
    taps = []
    for dh in (0, 1):
        for dw in (0, 1):
            t = w_r[:, :, dh, :, dw, :]                               # [o, c, ph, pw]
            t = jnp.transpose(t, (2, 3, 1, 0)).reshape(Kc, Cout)      # [(ph,pw,c), o]
            taps.append(t)
    w_taps = jnp.stack(taps, axis=0)                                  # [4, Kc, Cout]
    w_taps = jnp.pad(w_taps, ((0, 0), (0, 0), (0, Cp - Cout))).astype(jnp.bfloat16)

    gamma_p = jnp.pad(gamma.astype(jnp.float32).reshape(1, Cout),
                      ((0, 0), (0, Cp - Cout)))
    beta_p = jnp.pad(beta.astype(jnp.float32).reshape(1, Cout),
                     ((0, 0), (0, Cp - Cout)))

    # ---- tiling over output rows (one tile = TR full output rows) ----
    TR = _pick_row_tile(BHo, Wo)
    n_tiles = BHo // TR
    TRW = TR * Wo

    cparams = pltpu.CompilerParams(
        dimension_semantics=("parallel",),
        vmem_limit_bytes=32 * 1024 * 1024,
    )

    # Pass 1: conv (bf16 MXU, f32 acc) + per-tile partial BN statistics.
    y2d, sums, ssqs = pl.pallas_call(
        functools.partial(_conv_stats_kernel, wo=Wo),
        grid=(n_tiles,),
        in_specs=[
            pl.BlockSpec((TR, Wh, Kc), lambda i: (i, 0, 0)),
            pl.BlockSpec((TR, Wh, Kc), lambda i: (i, 0, 0)),
            pl.BlockSpec((4, Kc, Cp), lambda i: (0, 0, 0)),
        ],
        out_specs=[
            pl.BlockSpec((TRW, Cp), lambda i: (i, 0)),
            pl.BlockSpec((1, Cp), lambda i: (i, 0)),
            pl.BlockSpec((1, Cp), lambda i: (i, 0)),
        ],
        out_shape=[
            jax.ShapeDtypeStruct((M, Cp), jnp.float32),
            jax.ShapeDtypeStruct((n_tiles, Cp), jnp.float32),
            jax.ShapeDtypeStruct((n_tiles, Cp), jnp.float32),
        ],
        compiler_params=cparams,
    )(xs0, xs1, w_taps)

    # Pass 2: finalize BN (one scale/shift FMA per element) + ReLU.
    out2d = pl.pallas_call(
        functools.partial(_bn_relu_kernel, inv_m=1.0 / M),
        grid=(n_tiles,),
        in_specs=[
            pl.BlockSpec((TRW, Cp), lambda i: (i, 0)),
            pl.BlockSpec((n_tiles, Cp), lambda i: (0, 0)),
            pl.BlockSpec((n_tiles, Cp), lambda i: (0, 0)),
            pl.BlockSpec((1, Cp), lambda i: (0, 0)),
            pl.BlockSpec((1, Cp), lambda i: (0, 0)),
        ],
        out_specs=pl.BlockSpec((TRW, Cp), lambda i: (i, 0)),
        out_shape=jax.ShapeDtypeStruct((M, Cp), jnp.float32),
        compiler_params=cparams,
    )(y2d, sums, ssqs, gamma_p, beta_p)

    # Back to NCHW to match the PyTorch module.  (If the downstream consumer is
    # channels-last, return out2d[:, :Cout].reshape(B, Ho, Wo, Cout) instead and
    # skip this transpose.)
    out = out2d[:, :Cout].reshape(B, Ho, Wo, Cout)
    return jnp.transpose(out, (0, 3, 1, 2))


def _reference_genblock(x, weight, gamma, beta):
    """Pure-JAX im2col reference (bf16 matmul operands to match the kernel)."""
    B, Cin, H, W = x.shape
    Cout = weight.shape[0]
    k, s = 4, 2
    xp = jnp.pad(x, ((0, 0), (0, 0), (1, 1), (1, 1)), mode="reflect")
    Ho, Wo = H // 2, W // 2
    ih = (jnp.arange(Ho) * s)[:, None] + jnp.arange(k)[None, :]
    iw = (jnp.arange(Wo) * s)[:, None] + jnp.arange(k)[None, :]
    patches = xp[:, :, ih[:, :, None, None], iw[None, None, :, :]]
    patches = patches.transpose(0, 2, 4, 1, 3, 5).reshape(B * Ho * Wo, Cin * k * k)
    w2d = weight.reshape(Cout, Cin * k * k).T
    y = jnp.dot(patches.astype(jnp.bfloat16), w2d.astype(jnp.bfloat16),
                preferred_element_type=jnp.float32)
    mean = jnp.mean(y, axis=0, keepdims=True)
    var = jnp.mean((y - mean) ** 2, axis=0, keepdims=True)
    yb = (y - mean) * jax.lax.rsqrt(var + EPS)
    yb = yb * gamma.reshape(1, Cout) + beta.reshape(1, Cout)
    yb = jnp.maximum(yb, 0.0)
    return yb.reshape(B, Ho, Wo, Cout).transpose(0, 3, 1, 2)


if __name__ == "__main__":
    key = jax.random.PRNGKey(0)

    # First case = suggested small shapes (single tile); second exercises the
    # multi-tile grid + partial-stats reduction path.
    for (B, Cin, Cout, H, W) in ((2, 4, 8, 16, 16), (2, 4, 8, 64, 64)):
        k_x, k_w, key = jax.random.split(key, 3)
        x = jax.random.normal(k_x, (B, Cin, H, W), dtype=jnp.float32)
        weight = 0.05 * jax.random.normal(k_w, (Cout, Cin, 4, 4), dtype=jnp.float32)
        gamma = jnp.ones((Cout,), dtype=jnp.float32)   # BatchNorm defaults
        beta = jnp.zeros((Cout,), dtype=jnp.float32)

        y = gen_block_forward(x, weight, gamma, beta)
        jax.block_until_ready(y)
        assert y.shape == (B, Cout, H // 2, W // 2), y.shape

        y_ref = _reference_genblock(x, weight, gamma, beta)
        err = float(jnp.max(jnp.abs(y - y_ref)))
        assert err < 2e-3, f"max abs error {err} at shape {(B, Cin, Cout, H, W)}"

    print("KERNEL_OK")
</pallas_src>

<mosaic_0001>
module attributes {stable_mosaic.version = 11 : i64} {
  func.func @_conv_stats_kernel(%arg0: i32, %arg1: memref<16x9x16xbf16, #tpu.memory_space<vmem>>, %arg2: memref<16x9x16xbf16, #tpu.memory_space<vmem>>, %arg3: memref<4x16x128xbf16, #tpu.memory_space<vmem>>, %arg4: memref<128x128xf32, #tpu.memory_space<vmem>>, %arg5: memref<1x128xf32, #tpu.memory_space<vmem>>, %arg6: memref<1x128xf32, #tpu.memory_space<vmem>>) attributes {dimension_semantics = [#tpu.dimension_semantics<parallel>], iteration_bounds = array<i64: 1>, scalar_prefetch = 0 : i64, scratch_operands = 0 : i64, tpu.core_type = #tpu.core_type<tc>, window_params = [{transform_indices = @transform_0, window_bounds = array<i64: 16, 9, 16>}, {transform_indices = @transform_1, window_bounds = array<i64: 16, 9, 16>}, {pipeline_mode = #tpu.pipeline_mode<synchronous>, transform_indices = @transform_2, window_bounds = array<i64: 4, 16, 128>}, {transform_indices = @transform_3, window_bounds = array<i64: 128, 128>}, {transform_indices = @transform_4, window_bounds = array<i64: 1, 128>}, {transform_indices = @transform_5, window_bounds = array<i64: 1, 128>}]} {
    %c0 = arith.constant 0 : index
    %c0_0 = arith.constant 0 : index
    %c0_1 = arith.constant 0 : index
    %0 = vector.load %arg1[%c0, %c0_0, %c0_1] : memref<16x9x16xbf16, #tpu.memory_space<vmem>>, vector<16x8x16xbf16>
    %1 = vector.shape_cast %0 : vector<16x8x16xbf16> to vector<128x16xbf16>
    %c0_2 = arith.constant 0 : index
    %c0_3 = arith.constant 0 : index
    %c0_4 = arith.constant 0 : index
    %2 = vector.load %arg3[%c0_2, %c0_3, %c0_4] : memref<4x16x128xbf16, #tpu.memory_space<vmem>>, vector<1x16x128xbf16>
    %3 = vector.shape_cast %2 : vector<1x16x128xbf16> to vector<16x128xbf16>
    %cst = arith.constant dense<0.000000e+00> : vector<128x128xf32>
    %4 = tpu.matmul %1, %3, %cst {dimension_numbers = #tpu.dot_dimension_numbers<[1], [0], [0], [1], [0, 0, 1, 1], [], []>} : vector<128x16xbf16>, vector<16x128xbf16>, vector<128x128xf32> -> vector<128x128xf32>
    %c0_5 = arith.constant 0 : index
    %c1 = arith.constant 1 : index
    %c0_6 = arith.constant 0 : index
    %5 = vector.load %arg1[%c0_5, %c1, %c0_6] : memref<16x9x16xbf16, #tpu.memory_space<vmem>>, vector<16x8x16xbf16>
    %6 = vector.shape_cast %5 : vector<16x8x16xbf16> to vector<128x16xbf16>
    %c1_7 = arith.constant 1 : index
    %c0_8 = arith.constant 0 : index
    %c0_9 = arith.constant 0 : index
    %7 = vector.load %arg3[%c1_7, %c0_8, %c0_9] : memref<4x16x128xbf16, #tpu.memory_space<vmem>>, vector<1x16x128xbf16>
    %8 = vector.shape_cast %7 : vector<1x16x128xbf16> to vector<16x128xbf16>
    %cst_10 = arith.constant dense<0.000000e+00> : vector<128x128xf32>
    %9 = tpu.matmul %6, %8, %cst_10 {dimension_numbers = #tpu.dot_dimension_numbers<[1], [0], [0], [1], [0, 0, 1, 1], [], []>} : vector<128x16xbf16>, vector<16x128xbf16>, vector<128x128xf32> -> vector<128x128xf32>
    %10 = arith.addf %4, %9 : vector<128x128xf32>
    %c0_11 = arith.constant 0 : index
    %c0_12 = arith.constant 0 : index
    %c0_13 = arith.constant 0 : index
    %11 = vector.load %arg2[%c0_11, %c0_12, %c0_13] : memref<16x9x16xbf16, #tpu.memory_space<vmem>>, vector<16x8x16xbf16>
    %12 = vector.shape_cast %11 : vector<16x8x16xbf16> to vector<128x16xbf16>
    %c2 = arith.constant 2 : index
    %c0_14 = arith.constant 0 : index
    %c0_15 = arith.constant 0 : index
    %13 = vector.load %arg3[%c2, %c0_14, %c0_15] : memref<4x16x128xbf16, #tpu.memory_space<vmem>>, vector<1x16x128xbf16>
    %14 = vector.shape_cast %13 : vector<1x16x128xbf16> to vector<16x128xbf16>
    %cst_16 = arith.constant dense<0.000000e+00> : vector<128x128xf32>
    %15 = tpu.matmul %12, %14, %cst_16 {dimension_numbers = #tpu.dot_dimension_numbers<[1], [0], [0], [1], [0, 0, 1, 1], [], []>} : vector<128x16xbf16>, vector<16x128xbf16>, vector<128x128xf32> -> vector<128x128xf32>
    %16 = arith.addf %10, %15 : vector<128x128xf32>
    %c0_17 = arith.constant 0 : index
    %c1_18 = arith.constant 1 : index
    %c0_19 = arith.constant 0 : index
    %17 = vector.load %arg2[%c0_17, %c1_18, %c0_19] : memref<16x9x16xbf16, #tpu.memory_space<vmem>>, vector<16x8x16xbf16>
    %18 = vector.shape_cast %17 : vector<16x8x16xbf16> to vector<128x16xbf16>
    %c3 = arith.constant 3 : index
    %c0_20 = arith.constant 0 : index
    %c0_21 = arith.constant 0 : index
    %19 = vector.load %arg3[%c3, %c0_20, %c0_21] : memref<4x16x128xbf16, #tpu.memory_space<vmem>>, vector<1x16x128xbf16>
    %20 = vector.shape_cast %19 : vector<1x16x128xbf16> to vector<16x128xbf16>
    %cst_22 = arith.constant dense<0.000000e+00> : vector<128x128xf32>
    %21 = tpu.matmul %18, %20, %cst_22 {dimension_numbers = #tpu.dot_dimension_numbers<[1], [0], [0], [1], [0, 0, 1, 1], [], []>} : vector<128x16xbf16>, vector<16x128xbf16>, vector<128x128xf32> -> vector<128x128xf32>
    %22 = arith.addf %16, %21 : vector<128x128xf32>
    %c0_23 = arith.constant 0 : index
    %c0_24 = arith.constant 0 : index
    %23 = vector.load %arg4[%c0_23, %c0_24] : memref<128x128xf32, #tpu.memory_space<vmem>>, vector<128x128xf32>
    tpu.vector_store %arg4[%c0_23, %c0_24], %22 {strides = array<i32>} : memref<128x128xf32, #tpu.memory_space<vmem>>, vector<128x128xf32>,
    %cst_25 = arith.constant dense<0.000000e+00> : vector<128xf32>
    %24 = vector.multi_reduction <add>, %22, %cst_25 [0] : vector<128x128xf32> to vector<128xf32>
    %25 = vector.shape_cast %24 : vector<128xf32> to vector<1x128xf32>
    %c0_26 = arith.constant 0 : index
    %c0_27 = arith.constant 0 : index
    %26 = vector.load %arg5[%c0_26, %c0_27] : memref<1x128xf32, #tpu.memory_space<vmem>>, vector<1x128xf32>
    tpu.vector_store %arg5[%c0_26, %c0_27], %25 {strides = array<i32>} : memref<1x128xf32, #tpu.memory_space<vmem>>, vector<1x128xf32>,
    %27 = arith.mulf %22, %22 : vector<128x128xf32>
    %cst_28 = arith.constant dense<0.000000e+00> : vector<128xf32>
    %28 = vector.multi_reduction <add>, %27, %cst_28 [0] : vector<128x128xf32> to vector<128xf32>
    %29 = vector.shape_cast %28 : vector<128xf32> to vector<1x128xf32>
    %c0_29 = arith.constant 0 : index
    %c0_30 = arith.constant 0 : index
    %30 = vector.load %arg6[%c0_29, %c0_30] : memref<1x128xf32, #tpu.memory_space<vmem>>, vector<1x128xf32>
    tpu.vector_store %arg6[%c0_29, %c0_30], %29 {strides = array<i32>} : memref<1x128xf32, #tpu.memory_space<vmem>>, vector<1x128xf32>,
    return
  }
  func.func @transform_0(%arg0: i32) -> (i32, i32, i32) {
    %c0_i32 = arith.constant 0 : i32
    %c0_i32_0 = arith.constant 0 : i32
    %c0_i32_1 = arith.constant 0 : i32
    return %arg0, %c0_i32, %c0_i32_0 : i32, i32, i32
  }
  func.func @transform_1(%arg0: i32) -> (i32, i32, i32) {
    %c0_i32 = arith.constant 0 : i32
    %c0_i32_0 = arith.constant 0 : i32
    %c0_i32_1 = arith.constant 0 : i32
    return %arg0, %c0_i32, %c0_i32_0 : i32, i32, i32
  }
  func.func @transform_2(%arg0: i32) -> (i32, i32, i32) {
    %c0_i32 = arith.constant 0 : i32
    %c0_i32_0 = arith.constant 0 : i32
    %c0_i32_1 = arith.constant 0 : i32
    %c0_i32_2 = arith.constant 0 : i32
    return %c0_i32, %c0_i32_0, %c0_i32_1 : i32, i32, i32
  }
  func.func @transform_3(%arg0: i32) -> (i32, i32) {
    %c0_i32 = arith.constant 0 : i32
    %c0_i32_0 = arith.constant 0 : i32
    return %arg0, %c0_i32 : i32, i32
  }
  func.func @transform_4(%arg0: i32) -> (i32, i32) {
    %c0_i32 = arith.constant 0 : i32
    %c0_i32_0 = arith.constant 0 : i32
    return %arg0, %c0_i32 : i32, i32
  }
  func.func @transform_5(%arg0: i32) -> (i32, i32) {
    %c0_i32 = arith.constant 0 : i32
    %c0_i32_0 = arith.constant 0 : i32
    return %arg0, %c0_i32 : i32, i32
  }
}

</mosaic_0001>

<bundles_post_ra>
// kernel: tpu_custom_call.1
= control target key start
LH: loop header
LB: loop body
LE: loop exit
PB: predicated region body
PF: predicated region fallthrough
CT: control target
= control target key end

     0   :  { %11 = vsyncpa [#allocation3], 0  ;;  %vm314_vm0 = vcmask 130048   ;;  %vm54_vm1 = vsmask.f32 3328  ;;  %s2045_s0 = inlined_call_operand.vmem [shape: bf16[16,9,16], index: 0, kind: input, shape index: {}]   ;;  %s2046_s1 = inlined_call_operand.vmem [shape: bf16[16,9,16], index: 1, kind: input, shape index: {}]   ;;  %s2047_s2 = inlined_call_operand.vmem [shape: bf16[4,16,128], index: 2, kind: input, shape index: {}]   ;;  %s2048_s3 = inlined_call_operand.hbm [shape: f32[128,128], index: 3, kind: output, shape index: {0}]   ;;  %s2049_s4 = inlined_call_operand.hbm [shape: f32[1,128], index: 4, kind: output, shape index: {1}]   ;;  %s2050_s5 = inlined_call_operand.hbm [shape: f32[1,128], index: 5, kind: output, shape index: {2}]  }
   0x1   :  { %v1537_v0 = vld [vmem:[%s2047_s2] sm:$0xff]   ;;  %v1538_v1 = vld [vmem:[%s2047_s2 + $0x8] sm:$0xff]   ;;  %v22_v4 = vld [vmem:[%s2045_s0 + $0x10] sm:$0xf]  ;;  %vm55_vm2 = vsmask.f32 7440 }
   0x2   :  { %1478 = vmatprep.subr.bf16.mxu1 %v1537_v0  ;;  %v20_v2 = vld [vmem:[%s2045_s0] sm:$0xf]  ;;  %v21_v3 = vld [vmem:[%s2045_s0 + $0x8] sm:$0xf]  ;;  %1460 = vmatprep.subr.bf16.mxu0 %v1538_v1  ;;  %v23_v9 = vld [vmem:[%s2045_s0 + $0x18] sm:$0xf] }
   0x3   :  { %1479 = vmatpush3.bf16.msra.mxu1 %v1537_v0  ;;  %v58_v5 = vshrl.u32 %v20_v2, 16  ;;  %v61_v6 = vshll.u32 %v20_v2, 16  ;;  %v72_v7 = vshrl.u32 %v21_v3, 16  ;;  %v75_v8 = vshll.u32 %v21_v3, 16  ;;  %1461 = vmatpush3.bf16.msra.mxu0 %v1538_v1  ;;  %v38_v14 = vld [vmem:[%s2045_s0 + $0x4] sm:$0x1]  ;;  %vm1694_vm3 = vmor %vm54_vm1, %vm55_vm2 }
   0x4   :  { %v1369_v10 = vcombine.low %v20_v2, %v21_v3  ;;  %v86_v11 = vshrl.u32 %v22_v4, 16  ;;  %v89_v12 = vshll.u32 %v22_v4, 16  ;;  %v100_v13 = vshrl.u32 %v23_v9, 16  ;;  %v1680_v15 = vld [vmem:[%s2047_s2 + $0x10] sm:$0xff]   ;;  %v39_v20 = vld [vmem:[%s2045_s0 + $0xc] sm:$0x1] }
   0x5   :  { %v60_v16 = vrot.slane %v58_v5, 4  ;;  %v63_v17 = vrot.slane %v61_v6, 5  ;;  %v74_v18 = vrot.slane %v72_v7, 4  ;;  %v77_v19 = vrot.slane %v75_v8, 5  ;;  %1496 = vmatprep.subr.bf16.mxu0 %v1680_v15  ;;  %v40_v31 = vld [vmem:[%s2045_s0 + $0x14] sm:$0x1] }
   0x6   :  { %1480 = vmatprep.mubr.msk.bf16.mxu1 %vm314_vm0, %v1369_v10  ;;  %v88_v21 = vrot.slane %v86_v11, 4  ;;  %v91_v22 = vrot.slane %v89_v12, 5  ;;  %v102_v23 = vrot.slane %v100_v13, 4  ;;  %v103_v24 = vshll.u32 %v23_v9, 16  ;;  %v1542_v32 = vld [vmem:[%s2047_s2 + $0x18] sm:$0xff]  }
   0x7   :  { %v1370_v25 = vcombine.low %v22_v4, %v23_v9  ;;  %v64_v26 = vor.u32 %v63_v17, %v60_v16  ;;  %v67_v28 = vshll.u32 %v38_v14, 16  ;;  %v78_v29 = vor.u32 %v77_v19, %v74_v18  ;;  %v41_v35 = vld [vmem:[%s2045_s0 + $0x1c] sm:$0x1]  ;;  %1514 = vmatprep.subr.bf16.mxu1 %v1542_v32  ;;  %v24_v45 = vld [vmem:[%s2045_s0 + $0x20] sm:$0xf] }
   0x8   :  { %v105_v27 = vrot.slane %v103_v24, 5  ;;  %v81_v30 = vshll.u32 %v39_v20, 16  ;;  %v92_v36 = vor.u32 %v91_v22, %v88_v21  ;;  %v95_v37 = vshll.u32 %v40_v31, 16  ;;  %v25_v49 = vld [vmem:[%s2045_s0 + $0x28] sm:$0xf] }
   0x9   :  { %1481 = vmatmul.mubr.msk.bf16.vlgmr.msra.gmra.mxu1 %vm314_vm0, %v1370_v25  ;;  %v65_v34 = vrot.slane %v64_v26, 4  ;;  %v69_v38 = vrot.slane %v67_v28, 5  ;;  %v79_v39 = vrot.slane %v78_v29, 4  ;;  %v109_v44 = vshll.u32 %v41_v35, 16  ;;  %v26_v51 = vld [vmem:[%s2045_s0 + $0x30] sm:$0xf] }
   0xa   :  { %v83_v40 = vrot.slane %v81_v30, 5  ;;  %v106_v41 = vor.u32 %v105_v27, %v102_v23  ;;  %v93_v42 = vrot.slane %v92_v36, 4  ;;  %v97_v43 = vrot.slane %v95_v37, 5  ;;  %1515 = vmatpush3.bf16.msra.mxu1 %v1542_v32  ;;  %v27_v56 = vld [vmem:[%s2045_s0 + $0x38] sm:$0xf] }
   0xb   :  { %v70_v46 = vsel %vm1694_vm3, %v65_v34, %v69_v38  ;;  %v114_v50 = vshrl.u32 %v24_v45, 16  ;;  %v111_v54 = vrot.slane %v109_v44, 5  ;;  %v117_v55 = vshll.u32 %v24_v45, 16  ;;  %v42_v61 = vld [vmem:[%s2045_s0 + $0x24] sm:$0x1] }
   0xc   :  { %v84_v47 = vsel %vm1694_vm3, %v79_v39, %v83_v40  ;;  %v107_v48 = vrot.slane %v106_v41, 4  ;;  %v98_v53 = vsel %vm1694_vm3, %v93_v42, %v97_v43  ;;  %v128_v58 = vshrl.u32 %v25_v49, 16  ;;  %v43_v2 = vld [vmem:[%s2045_s0 + $0x2c] sm:$0x1]  ;;  %v44_v7 = vld [vmem:[%s2045_s0 + $0x34] sm:$0x1] }
   0xd   :  { %v1352_v52 = vcombine.low %v70_v46, %v84_v47  ;;  %v116_v57 = vrot.slane %v114_v50, 4  ;;  %v131_v59 = vshll.u32 %v25_v49, 16  ;;  %v1371_v60 = vcombine.low %v24_v45, %v25_v49  ;;  %v45_v12 = vld [vmem:[%s2045_s0 + $0x3c] sm:$0x1]  ;;  %v28_v22 = vld [vmem:[%s2045_s0 + $0x40] sm:$0xf] }
   0xe   :  { %v112_v62 = vsel %vm1694_vm3, %v107_v48, %v111_v54  ;;  %v119_v63 = vrot.slane %v117_v55, 5  ;;  %v142_v0 = vshrl.u32 %v26_v51, 16  ;;  %v145_v1 = vshll.u32 %v26_v51, 16  ;;  %v29_v27 = vld [vmem:[%s2045_s0 + $0x48] sm:$0xf] }
   0xf   :  { %1462 = vmatprep.mubr.msk.bf16.mxu0 %vm314_vm0, %v1352_v52  ;;  %v1353_v3 = vcombine.low %v98_v53, %v112_v62  ;;  %v130_v4 = vrot.slane %v128_v58, 4  ;;  %v133_v5 = vrot.slane %v131_v59, 5  ;;  %1484 = vmatprep.mubr.msk.bf16.mxu1 %vm314_vm0, %v1371_v60  ;;  %v156_v6 = vshrl.u32 %v27_v56, 16  ;;  %v30_v36 = vld [vmem:[%s2045_s0 + $0x50] sm:$0xf] }
  0x10   :  { %v144_v8 = vrot.slane %v142_v0, 4  ;;  %v147_v9 = vrot.slane %v145_v1, 5  ;;  %v159_v10 = vshll.u32 %v27_v56, 16  ;;  %v1372_v11 = vcombine.low %v26_v51, %v27_v56  ;;  %v31_v41 = vld [vmem:[%s2045_s0 + $0x58] sm:$0xf] }
  0x11   :  { %1463 = vmatmul.mubr.msk.bf16.vlgmr.msra.gmra.mxu0 %vm314_vm0, %v1353_v3  ;;  %v158_v13 = vrot.slane %v156_v6, 4  ;;  %v120_v14 = vor.u32 %v119_v63, %v116_v57  ;;  %v123_v16 = vshll.u32 %v42_v61, 16  ;;  %v134_v17 = vor.u32 %v133_v5, %v130_v4  ;;  %v46_v50 = vld [vmem:[%s2045_s0 + $0x44] sm:$0x1]  ;;  %v47_v51 = vld [vmem:[%s2045_s0 + $0x4c] sm:$0x1] }
  0x12   :  { %1497 = vmatpush3.bf16.msra.mxu0 %v1680_v15  ;;  %v161_v18 = vrot.slane %v159_v10, 5  ;;  %1485 = vmatmul.mubr.msk.bf16.gmra.mxu1 %vm314_vm0, %v1372_v11  ;;  %v137_v19 = vshll.u32 %v43_v2, 16  ;;  %v148_v20 = vor.u32 %v147_v9, %v144_v8  ;;  %v151_v21 = vshll.u32 %v44_v7, 16  ;;  %v48_v56 = vld [vmem:[%s2045_s0 + $0x54] sm:$0x1] }
  0x13   :  { %v121_v23 = vrot.slane %v120_v14, 4  ;;  %v125_v24 = vrot.slane %v123_v16, 5  ;;  %v135_v25 = vrot.slane %v134_v17, 4  ;;  %v165_v26 = vshll.u32 %v45_v12, 16  ;;  %v49_v61 = vld [vmem:[%s2045_s0 + $0x5c] sm:$0x1] }
  0x14   :  { %v139_v28 = vrot.slane %v137_v19, 5  ;;  %v149_v15 = vrot.slane %v148_v20, 4  ;;  %v153_v29 = vrot.slane %v151_v21, 5  ;;  %v162_v30 = vor.u32 %v161_v18, %v158_v13  ;;  %v32_v2 = vld [vmem:[%s2045_s0 + $0x60] sm:$0xf] }
  0x15   :  { %v126_v31 = vsel %vm1694_vm3, %v121_v23, %v125_v24  ;;  %v167_v32 = vrot.slane %v165_v26, 5  ;;  %v170_v34 = vshrl.u32 %v28_v22, 16  ;;  %v173_v35 = vshll.u32 %v28_v22, 16  ;;  %v33_v11 = vld [vmem:[%s2045_s0 + $0x68] sm:$0xf] }
  0x16   :  { %v140_v37 = vsel %vm1694_vm3, %v135_v25, %v139_v28  ;;  %v154_v38 = vsel %vm1694_vm3, %v149_v15, %v153_v29  ;;  %v163_v39 = vrot.slane %v162_v30, 4  ;;  %v184_v40 = vshrl.u32 %v29_v27, 16  ;;  %v34_v17 = vld [vmem:[%s2045_s0 + $0x70] sm:$0xf] }
  0x17   :  { %v1354_v42 = vcombine.low %v126_v31, %v140_v37  ;;  %v172_v43 = vrot.slane %v170_v34, 4  ;;  %v175_v44 = vrot.slane %v173_v35, 5  ;;  %v187_v45 = vshll.u32 %v29_v27, 16  ;;  %v51_v31 = vld [vmem:[%s2045_s0 + $0x6c] sm:$0x1] }
  0x18   :  { %v168_v46 = vsel %vm1694_vm3, %v163_v39, %v167_v32  ;;  %v186_v47 = vrot.slane %v184_v40, 4  ;;  %v1373_v48 = vcombine.low %v28_v22, %v29_v27  ;;  %v198_v49 = vshrl.u32 %v30_v36, 16  ;;  %v35_v22 = vld [vmem:[%s2045_s0 + $0x78] sm:$0xf]  ;;  %v50_v27 = vld [vmem:[%s2045_s0 + $0x64] sm:$0x1] }
  0x19   :  { %1466 = vmatprep.mubr.msk.bf16.mxu0 %vm314_vm0, %v1354_v42  ;;  %v1355_v52 = vcombine.low %v154_v38, %v168_v46  ;;  %v189_v53 = vrot.slane %v187_v45, 5  ;;  %v201_v54 = vshll.u32 %v30_v36, 16  ;;  %v212_v55 = vshrl.u32 %v31_v41, 16  ;;  %v52_v32 = vld [vmem:[%s2045_s0 + $0x74] sm:$0x1] }
  0x1a   :  { %1488 = vmatprep.mubr.msk.bf16.mxu1 %vm314_vm0, %v1373_v48  ;;  %v200_v57 = vrot.slane %v198_v49, 4  ;;  %v215_v58 = vshll.u32 %v31_v41, 16  ;;  %v1374_v59 = vcombine.low %v30_v36, %v31_v41  ;;  %v176_v60 = vor.u32 %v175_v44, %v172_v43  ;;  %v53_v38 = vld [vmem:[%s2045_s0 + $0x7c] sm:$0x1] }
  0x1b   :  { %1467 = vmatmul.mubr.msk.bf16.gmra.mxu0 %vm314_vm0, %v1355_v52  ;;  %v203_v62 = vrot.slane %v201_v54, 5  ;;  %v214_v63 = vrot.slane %v212_v55, 4  ;;  %v179_v0 = vshll.u32 %v46_v50, 16  ;;  %v190_v1 = vor.u32 %v189_v53, %v186_v47  ;;  %v805_v47 = vld [vmem:[%s2046_s1] sm:$0xf] }
  0x1c   :  { %v217_v3 = vrot.slane %v215_v58, 5  ;;  %1489 = vmatmul.mubr.msk.bf16.gmra.mxu1 %vm314_vm0, %v1374_v59  ;;  %v177_v4 = vrot.slane %v176_v60, 4  ;;  %v193_v5 = vshll.u32 %v47_v51, 16  ;;  %v207_v6 = vshll.u32 %v48_v56, 16  ;;  %v806_v56 = vld [vmem:[%s2046_s1 + $0x4] sm:$0x1] }
  0x1d   :  { %v181_v7 = vrot.slane %v179_v0, 5  ;;  %v191_v8 = vrot.slane %v190_v1, 4  ;;  %v204_v9 = vor.u32 %v203_v62, %v200_v57  ;;  %v221_v10 = vshll.u32 %v49_v61, 16  ;;  %v807_v61 = vld [vmem:[%s2046_s1 + $0x8] sm:$0xf] }
  0x1e   :  { %v195_v12 = vrot.slane %v193_v5, 5  ;;  %v209_v13 = vrot.slane %v207_v6, 5  ;;  %v218_v14 = vor.u32 %v217_v3, %v214_v63  ;;  %v226_v16 = vshrl.u32 %v32_v2, 16  ;;  %v808_v1 = vld [vmem:[%s2046_s1 + $0xc] sm:$0x1] }
  0x1f   :  { %v182_v18 = vsel %vm1694_vm3, %v177_v4, %v181_v7  ;;  %v205_v19 = vrot.slane %v204_v9, 4  ;;  %v223_v20 = vrot.slane %v221_v10, 5  ;;  %v229_v21 = vshll.u32 %v32_v2, 16  ;;  %v809_v7 = vld [vmem:[%s2046_s1 + $0x10] sm:$0xf] }
  0x20   :  { %v196_v23 = vsel %vm1694_vm3, %v191_v8, %v195_v12  ;;  %v219_v24 = vrot.slane %v218_v14, 4  ;;  %v228_v25 = vrot.slane %v226_v16, 4  ;;  %v240_v26 = vshrl.u32 %v33_v11, 16  ;;  %v810_v12 = vld [vmem:[%s2046_s1 + $0x14] sm:$0x1] }
  0x21   :  { %v1356_v28 = vcombine.low %v182_v18, %v196_v23  ;;  %v210_v15 = vsel %vm1694_vm3, %v205_v19, %v209_v13  ;;  %v231_v29 = vrot.slane %v229_v21, 5  ;;  %v243_v30 = vshll.u32 %v33_v11, 16  ;;  %v811_v18 = vld [vmem:[%s2046_s1 + $0x18] sm:$0xf]  ;;  %v812_v19 = vld [vmem:[%s2046_s1 + $0x1c] sm:$0x1] }
  0x22   :  { %v224_v34 = vsel %vm1694_vm3, %v219_v24, %v223_v20  ;;  %v242_v35 = vrot.slane %v240_v26, 4  ;;  %v1375_v36 = vcombine.low %v32_v2, %v33_v11  ;;  %v254_v37 = vshrl.u32 %v34_v17, 16  ;;  %v1549_v24 = vld [vmem:[%s2046_s1] ss:$8 sps:$4 sm:$0xff]  }
  0x23   :  { %1470 = vmatprep.mubr.msk.bf16.mxu0 %vm314_vm0, %v1356_v28  ;;  %v1357_v39 = vcombine.low %v210_v15, %v224_v34  ;;  %v245_v40 = vrot.slane %v243_v30, 5  ;;  %v257_v41 = vshll.u32 %v34_v17, 16  ;;  %v268_v42 = vshrl.u32 %v35_v22, 16  ;;  %v813_v15 = vld [vmem:[%s2046_s1 + $0x20] sm:$0xf] }
  0x24   :  { %1492 = vmatprep.mubr.msk.bf16.mxu1 %vm314_vm0, %v1375_v36  ;;  %v256_v43 = vrot.slane %v254_v37, 4  ;;  %v271_v44 = vshll.u32 %v35_v22, 16  ;;  %v1376_v45 = vcombine.low %v34_v17, %v35_v22  ;;  %v232_v46 = vor.u32 %v231_v29, %v228_v25  ;;  %v814_v34 = vld [vmem:[%s2046_s1 + $0x24] sm:$0x1] }
  0x25   :  { %1471 = vmatmul.mubr.msk.bf16.gmra.mxu0 %vm314_vm0, %v1357_v39  ;;  %v259_v48 = vrot.slane %v257_v41, 5  ;;  %v270_v49 = vrot.slane %v268_v42, 4  ;;  %v235_v50 = vshll.u32 %v50_v27, 16  ;;  %v246_v51 = vor.u32 %v245_v40, %v242_v35  ;;  %v815_v39 = vld [vmem:[%s2046_s1 + $0x28] sm:$0xf] }
  0x26   :  { %v273_v52 = vrot.slane %v271_v44, 5  ;;  %1493 = vmatmul.mubr.msk.bf16.gmra.mxu1 %vm314_vm0, %v1376_v45  ;;  %v233_v53 = vrot.slane %v232_v46, 4  ;;  %v249_v54 = vshll.u32 %v51_v31, 16  ;;  %v263_v55 = vshll.u32 %v52_v32, 16 }
  0x27   :  { %v237_v57 = vrot.slane %v235_v50, 5  ;;  %v247_v58 = vrot.slane %v246_v51, 4  ;;  %v260_v59 = vor.u32 %v259_v48, %v256_v43  ;;  %v277_v60 = vshll.u32 %v53_v38, 16  ;;  %v816_v48 = vld [vmem:[%s2046_s1 + $0x2c] sm:$0x1] }
  0x28   :  { %v251_v62 = vrot.slane %v249_v54, 5  ;;  %v265_v63 = vrot.slane %v263_v55, 5  ;;  %v274_v0 = vor.u32 %v273_v52, %v270_v49  ;;  %v838_v2 = vshrl.u32 %v805_v47, 16  ;;  %v817_v54 = vld [vmem:[%s2046_s1 + $0x30] sm:$0xf] }
  0x29   :  { %v238_v3 = vsel %vm1694_vm3, %v233_v53, %v237_v57  ;;  %v261_v4 = vrot.slane %v260_v59, 4  ;;  %v279_v5 = vrot.slane %v277_v60, 5  ;;  %v841_v6 = vshll.u32 %v805_v47, 16  ;;  %v1550_v47 = vld [vmem:[%s2046_s1 + $0x10] ss:$8 sps:$4 sm:$0xff]  }
  0x2a   :  { %v252_v8 = vsel %vm1694_vm3, %v247_v58, %v251_v62  ;;  %v275_v9 = vrot.slane %v274_v0, 4  ;;  %v840_v10 = vrot.slane %v838_v2, 4  ;;  %v847_v11 = vshll.u32 %v806_v56, 16  ;;  %v818_v59 = vld [vmem:[%s2046_s1 + $0x34] sm:$0x1] }
  0x2b   :  { %v1358_v13 = vcombine.low %v238_v3, %v252_v8  ;;  %v266_v14 = vsel %vm1694_vm3, %v261_v4, %v265_v63  ;;  %v843_v16 = vrot.slane %v841_v6, 5  ;;  %v852_v17 = vshrl.u32 %v807_v61, 16  ;;  %v1551_v0 = vld [vmem:[%s2046_s1 + $0x20] ss:$8 sps:$4 sm:$0xff]  }
  0x2c   :  { %v280_v20 = vsel %vm1694_vm3, %v275_v9, %v279_v5  ;;  %v849_v21 = vrot.slane %v847_v11, 5  ;;  %v855_v22 = vshll.u32 %v807_v61, 16  ;;  %v861_v23 = vshll.u32 %v808_v1, 16  ;;  %v819_v9 = vld [vmem:[%s2046_s1 + $0x38] sm:$0xf] }
  0x2d   :  { %1474 = vmatprep.mubr.msk.bf16.mxu0 %vm314_vm0, %v1358_v13  ;;  %v1359_v25 = vcombine.low %v266_v14, %v280_v20  ;;  %v844_v26 = vor.u32 %v843_v16, %v840_v10  ;;  %v854_v27 = vrot.slane %v852_v17, 4  ;;  %v866_v28 = vshrl.u32 %v809_v7, 16  ;;  %v820_v11 = vld [vmem:[%s2046_s1 + $0x3c] sm:$0x1]  ;;  %v821_v20 = vld [vmem:[%s2046_s1 + $0x40] sm:$0xf] }
  0x2e   :  { %v857_v29 = vrot.slane %v855_v22, 5  ;;  %v863_v30 = vrot.slane %v861_v23, 5  ;;  %v869_v31 = vshll.u32 %v809_v7, 16  ;;  %v875_v32 = vshll.u32 %v810_v12, 16 }
  0x2f   :  { %1475 = vmatmul.mubr.msk.bf16.gmra.mxu0 %vm314_vm0, %v1359_v25  ;;  %v845_v35 = vrot.slane %v844_v26, 4  ;;  %v868_v36 = vrot.slane %v866_v28, 4  ;;  %v880_v37 = vshrl.u32 %v811_v18, 16  ;;  %v883_v38 = vshll.u32 %v811_v18, 16  ;;  %v1552_v26 = vld [vmem:[%s2046_s1 + $0x30] ss:$8 sps:$4 sm:$0xff]  }
  0x30   :  { %v858_v40 = vor.u32 %v857_v29, %v854_v27  ;;  %v871_v41 = vrot.slane %v869_v31, 5  ;;  %v877_v42 = vrot.slane %v875_v32, 5  ;;  %v889_v43 = vshll.u32 %v812_v19, 16  ;;  %1498 = vmatprep.mubr.msk.bf16.mxu0 %vm314_vm0, %v1549_v24  ;;  %v823_v27 = vld [vmem:[%s2046_s1 + $0x48] sm:$0xf] }
  0x31   :  { %v850_v44 = vsel %vm1694_vm3, %v845_v35, %v849_v21  ;;  %v882_v45 = vrot.slane %v880_v37, 4  ;;  %v885_v46 = vrot.slane %v883_v38, 5  ;;  %v894_v49 = vshrl.u32 %v813_v15, 16  ;;  %v822_v21 = vld [vmem:[%s2046_s1 + $0x44] sm:$0x1] }
  0x32   :  { %v859_v50 = vrot.slane %v858_v40, 4  ;;  %v872_v51 = vor.u32 %v871_v41, %v868_v36  ;;  %v891_v52 = vrot.slane %v889_v43, 5  ;;  %v897_v53 = vshll.u32 %v813_v15, 16  ;;  %v824_v31 = vld [vmem:[%s2046_s1 + $0x4c] sm:$0x1] }
  0x33   :  { %v886_v55 = vor.u32 %v885_v46, %v882_v45  ;;  %v896_v56 = vrot.slane %v894_v49, 4  ;;  %v903_v57 = vshll.u32 %v814_v34, 16  ;;  %v908_v58 = vshrl.u32 %v815_v39, 16  ;;  %v825_v32 = vld [vmem:[%s2046_s1 + $0x50] sm:$0xf] }
  0x34   :  { %v864_v60 = vsel %vm1694_vm3, %v859_v50, %v863_v30  ;;  %v873_v61 = vrot.slane %v872_v51, 4  ;;  %v899_v62 = vrot.slane %v897_v53, 5  ;;  %v911_v63 = vshll.u32 %v815_v39, 16  ;;  %v1553_v38 = vld [vmem:[%s2046_s1 + $0x40] ss:$8 sps:$4 sm:$0xff]  }
  0x35   :  { %v1407_v1 = vcombine.low %v850_v44, %v864_v60  ;;  %v887_v2 = vrot.slane %v886_v55, 4  ;;  %v905_v3 = vrot.slane %v903_v57, 5  ;;  %v910_v4 = vrot.slane %v908_v58, 4  ;;  %v826_v51 = vld [vmem:[%s2046_s1 + $0x54] sm:$0x1] }
  0x36   :  { %v878_v5 = vsel %vm1694_vm3, %v873_v61, %v877_v42  ;;  %v900_v6 = vor.u32 %v899_v62, %v896_v56  ;;  %v913_v7 = vrot.slane %v911_v63, 5  ;;  %v917_v8 = vshll.u32 %v816_v48, 16  ;;  %v827_v55 = vld [vmem:[%s2046_s1 + $0x58] sm:$0xf]  ;;  %v828_v63 = vld [vmem:[%s2046_s1 + $0x5c] sm:$0x1] }
  0x37   :  { %1516 = vmatprep.mubr.msk.bf16.mxu1 %vm314_vm0, %v1407_v1  ;;  %v892_v10 = vsel %vm1694_vm3, %v887_v2, %v891_v52  ;;  %1499 = vmatmul.mubr.msk.bf16.vlgmr.msra.gmra.mxu0 %vm314_vm0, %v1550_v47  ;;  %v922_v12 = vshrl.u32 %v817_v54, 16  ;;  %v925_v13 = vshll.u32 %v817_v54, 16  ;;  %v931_v14 = vshll.u32 %v818_v59, 16 }
  0x38   :  { %v1408_v16 = vcombine.low %v878_v5, %v892_v10  ;;  %v901_v17 = vrot.slane %v900_v6, 4  ;;  %v914_v18 = vor.u32 %v913_v7, %v910_v4  ;;  %v919_v19 = vrot.slane %v917_v8, 5  ;;  %1502 = vmatprep.mubr.msk.bf16.mxu0 %vm314_vm0, %v1551_v0  ;;  %v829_v6 = vld [vmem:[%s2046_s1 + $0x60] sm:$0xf]  ;;  %v830_v7 = vld [vmem:[%s2046_s1 + $0x64] sm:$0x1] }
  0x39   :  { %v924_v22 = vrot.slane %v922_v12, 4  ;;  %v927_v23 = vrot.slane %v925_v13, 5  ;;  %v933_v24 = vrot.slane %v931_v14, 5  ;;  %v936_v25 = vshrl.u32 %v819_v9, 16  ;;  %v1554_v12 = vld [vmem:[%s2046_s1 + $0x50] ss:$8 sps:$4 sm:$0xff]  }
  0x3a   :  { %1517 = vmatmul.mubr.msk.bf16.vlgmr.msra.gmra.mxu1 %vm314_vm0, %v1408_v16  ;;  %v906_v28 = vsel %vm1694_vm3, %v901_v17, %v905_v3  ;;  %v915_v15 = vrot.slane %v914_v18, 4  ;;  %v939_v29 = vshll.u32 %v819_v9, 16  ;;  %v945_v30 = vshll.u32 %v820_v11, 16  ;;  %v831_v13 = vld [vmem:[%s2046_s1 + $0x68] sm:$0xf] }
  0x3b   :  { %v928_v34 = vor.u32 %v927_v23, %v924_v22  ;;  %v938_v35 = vrot.slane %v936_v25, 4  ;;  %v950_v36 = vshrl.u32 %v821_v20, 16  ;;  %v953_v37 = vshll.u32 %v821_v20, 16  ;;  %v833_v20 = vld [vmem:[%s2046_s1 + $0x70] sm:$0xf] }
  0x3c   :  { %v920_v39 = vsel %vm1694_vm3, %v915_v15, %v919_v19  ;;  %v941_v40 = vrot.slane %v939_v29, 5  ;;  %v947_v41 = vrot.slane %v945_v30, 5  ;;  %v959_v42 = vshll.u32 %v822_v21, 16  ;;  %v832_v19 = vld [vmem:[%s2046_s1 + $0x6c] sm:$0x1] }
  0x3d   :  { %v1409_v43 = vcombine.low %v906_v28, %v920_v39  ;;  %v929_v44 = vrot.slane %v928_v34, 4  ;;  %v952_v45 = vrot.slane %v950_v36, 4  ;;  %v955_v46 = vrot.slane %v953_v37, 5  ;;  %v835_v25 = vld [vmem:[%s2046_s1 + $0x78] sm:$0xf] }
  0x3e   :  { %v942_v47 = vor.u32 %v941_v40, %v938_v35  ;;  %v961_v48 = vrot.slane %v959_v42, 5  ;;  %v964_v49 = vshrl.u32 %v823_v27, 16  ;;  %v967_v50 = vshll.u32 %v823_v27, 16  ;;  %v1555_v29 = vld [vmem:[%s2046_s1 + $0x60] ss:$8 sps:$4 sm:$0xff]  }
  0x3f   :  { %1520 = vmatprep.mubr.msk.bf16.mxu1 %vm314_vm0, %v1409_v43  ;;  %v934_v52 = vsel %vm1694_vm3, %v929_v44, %v933_v24  ;;  %1503 = vmatmul.mubr.msk.bf16.gmra.mxu0 %vm314_vm0, %v1552_v26  ;;  %v956_v53 = vor.u32 %v955_v46, %v952_v45  ;;  %v973_v54 = vshll.u32 %v824_v31, 16  ;;  %v978_v56 = vshrl.u32 %v825_v32, 16 }
  0x40   :  { %v943_v57 = vrot.slane %v942_v47, 4  ;;  %v966_v58 = vrot.slane %v964_v49, 4  ;;  %v969_v59 = vrot.slane %v967_v50, 5  ;;  %v981_v60 = vshll.u32 %v825_v32, 16  ;;  %1506 = vmatprep.mubr.msk.bf16.mxu0 %vm314_vm0, %v1553_v38  ;;  %v834_v38 = vld [vmem:[%s2046_s1 + $0x74] sm:$0x1] }
  0x41   :  { %v957_v61 = vrot.slane %v956_v53, 4  ;;  %v975_v62 = vrot.slane %v973_v54, 5  ;;  %v980_v0 = vrot.slane %v978_v56, 4  ;;  %v987_v1 = vshll.u32 %v826_v51, 16 }
  0x42   :  { %v948_v2 = vsel %vm1694_vm3, %v943_v57, %v947_v41  ;;  %v970_v3 = vor.u32 %v969_v59, %v966_v58  ;;  %v983_v4 = vrot.slane %v981_v60, 5  ;;  %v992_v5 = vshrl.u32 %v827_v55, 16 }
  0x43   :  { %v1410_v8 = vcombine.low %v934_v52, %v948_v2  ;;  %v962_v9 = vsel %vm1694_vm3, %v957_v61, %v961_v48  ;;  %v989_v10 = vrot.slane %v987_v1, 5  ;;  %v995_v11 = vshll.u32 %v827_v55, 16 }
  0x44   :  { %v971_v14 = vrot.slane %v970_v3, 4  ;;  %v984_v16 = vor.u32 %v983_v4, %v980_v0  ;;  %v994_v17 = vrot.slane %v992_v5, 4  ;;  %v1001_v18 = vshll.u32 %v828_v63, 16 }
  0x45   :  { %1521 = vmatmul.mubr.msk.bf16.gmra.mxu1 %vm314_vm0, %v1410_v8  ;;  %v997_v21 = vrot.slane %v995_v11, 5  ;;  %v1006_v22 = vshrl.u32 %v829_v6, 16  ;;  %v1009_v23 = vshll.u32 %v829_v6, 16  ;;  %v1015_v24 = vshll.u32 %v830_v7, 16 }
  0x46   :  { %v976_v26 = vsel %vm1694_vm3, %v971_v14, %v975_v62  ;;  %v985_v27 = vrot.slane %v984_v16, 4  ;;  %v1003_v28 = vrot.slane %v1001_v18, 5  ;;  %v1020_v15 = vshrl.u32 %v831_v13, 16 }
  0x47   :  { %v1411_v30 = vcombine.low %v962_v9, %v976_v26  ;;  %v998_v31 = vor.u32 %v997_v21, %v994_v17  ;;  %1507 = vmatmul.mubr.msk.bf16.gmra.mxu0 %vm314_vm0, %v1554_v12  ;;  %v1008_v32 = vrot.slane %v1006_v22, 4  ;;  %v1011_v34 = vrot.slane %v1009_v23, 5 }
  0x48   :  { %v990_v35 = vsel %vm1694_vm3, %v985_v27, %v989_v10  ;;  %v1022_v36 = vrot.slane %v1020_v15, 4  ;;  %v1023_v37 = vshll.u32 %v831_v13, 16  ;;  %1510 = vmatprep.mubr.msk.bf16.mxu0 %vm314_vm0, %v1555_v29  ;;  %v1029_v41 = vshll.u32 %v832_v19, 16 }
  0x49   :  { %1524 = vmatprep.mubr.msk.bf16.mxu1 %vm314_vm0, %v1411_v30  ;;  %v999_v39 = vrot.slane %v998_v31, 4  ;;  %v1012_v40 = vor.u32 %v1011_v34, %v1008_v32  ;;  %v1034_v42 = vshrl.u32 %v833_v20, 16 }
  0x4a   :  { %12 = vsyncpa [#allocation5], 0  ;;  %v1017_v43 = vrot.slane %v1015_v24, 5  ;;  %v1025_v44 = vrot.slane %v1023_v37, 5  ;;  %v836_v45 = vld [vmem:[%s2046_s1 + $0x7c] sm:$0x1] }
  0x4b   :  { %v1037_v46 = vshll.u32 %v833_v20, 16  ;;  %v1048_v47 = vshrl.u32 %v835_v25, 16  ;;  %v1004_v48 = vsel %vm1694_vm3, %v999_v39, %v1003_v28  ;;  %v1013_v49 = vrot.slane %v1012_v40, 4  ;;  %v1556_v52 = vld [vmem:[%s2046_s1 + $0x70] ss:$8 sps:$4 sm:$0xff]   ;;  %s1621_s1 = smov [#allocation2]  }
  0x4c   :  { %v1036_v50 = vrot.slane %v1034_v42, 4  ;;  %v1043_v51 = vshll.u32 %v834_v38, 16  ;;  %v1412_v53 = vcombine.low %v990_v35, %v1004_v48  ;;  %v1026_v54 = vor.u32 %v1025_v44, %v1022_v36  ;;  %s1312_s12 = sshll.u32 %s1621_s1, 4  ;;  %s1313_s12 = int_to_ptr.vmem [resolvable:$true] %s1312_s12 }
  0x4d   :  { %v1031_v55 = vrot.slane %v1029_v41, 5  ;;  %v1039_v56 = vrot.slane %v1037_v46, 5  ;;  %v1050_v57 = vrot.slane %v1048_v47, 4  ;;  %v1051_v58 = vshll.u32 %v835_v25, 16  ;;  %s1557_s13 = scalar_lea.vmem %s1313_s12, 2048  ;;  %p1562_p1 = scmp.lt.s32.totalorder %s1313_s12, %s1313_s12 }
  0x4e   :  { %v1057_v59 = vshll.u32 %v836_v45, 16  ;;  %1525 = vmatmul.mubr.msk.bf16.gmra.mxu1 %vm314_vm0, %v1412_v53  ;;  %v1018_v60 = vsel %vm1694_vm3, %v1013_v49, %v1017_v43  ;;  %v1027_v61 = vrot.slane %v1026_v54, 4  ;;  %v1045_v63 = vrot.slane %v1043_v51, 5  ;;  %p1558_p0 = scmp.ne.s32.totalorder %s1313_s12, %s1557_s13  ;;  %p1563_p2 = scmp.lt.s32.totalorder %s1557_s13, %s1557_s13 }
  0x4f   :  { %v1040_v62 = vor.u32 %v1039_v56, %v1036_v50  ;;  %v1053_v0 = vrot.slane %v1051_v58, 5  ;;  %1511 = vmatmul.mubr.msk.bf16.gmra.mxu0 %vm314_vm0, %v1556_v52 }
  0x50   :  { %v1032_v1 = vsel %vm1694_vm3, %v1027_v61, %v1031_v55  ;;  %v1059_v5 = vrot.slane %v1057_v59, 5  ;;  %p1564_p3 = por %p1563_p2, %p1562_p1 }
  0x51   :  { %v1041_v2 = vrot.slane %v1040_v62, 4  ;;  %v1413_v3 = vcombine.low %v1018_v60, %v1032_v1  ;;  %v1054_v4 = vor.u32 %v1053_v0, %v1050_v57 }
  0x52   :  { %p1565_p4 = pnand %p1564_p3, %p1558_p0 }
  0x53   :  { %1528 = vmatprep.mubr.msk.bf16.mxu1 %vm314_vm0, %v1413_v3  ;;  %v1046_v6 = vsel %vm1694_vm3, %v1041_v2, %v1045_v63  ;;  %v1055_v7 = vrot.slane %v1054_v4, 4 }
  0x55   :  { %v1060_v8 = vsel %vm1694_vm3, %v1055_v7, %v1059_v5 }
  0x56   :  { %v1414_v9 = vcombine.low %v1046_v6, %v1060_v8 }
  0x58   :  { %1529 = vmatmul.mubr.msk.bf16.gmra.mxu1 %vm314_vm0, %v1414_v9 }
  0xc9   :  { %v1482_v10 = vpop.f32.mrf.mxu1 }
  0xcb   :  { %v540_v11 = vpop.f32.mrf.mxu1 }
  0xcd   :  { %v1483_v12 = vpop.f32.mrf.mxu1 }
  0xcf   :  { %v543_v13 = vpop.f32.mrf.mxu1 }
  0xd1   :  { %v1464_v14 = vpop.f32.mrf.mxu0 }
  0xd2   :  { %v1486_v16 = vpop.f32.mrf.mxu1  ;;  %v549_v41 = vadd.f32 %v1482_v10, %v1464_v14 }
  0xd3   :  { %v373_v17 = vpop.f32.mrf.mxu0 }
  0xd4   :  { %v556_v18 = vpop.f32.mrf.mxu1  ;;  %v541_v44 = vadd.f32 %v540_v11, %v373_v17 }
  0xd5   :  { %v1465_v19 = vpop.f32.mrf.mxu0 }
  0xd6   :  { %v1487_v20 = vpop.f32.mrf.mxu1  ;;  %v552_v47 = vadd.f32 %v1483_v12, %v1465_v19 }
  0xd7   :  { %v376_v21 = vpop.f32.mrf.mxu0 }
  0xd8   :  { %v559_v22 = vpop.f32.mrf.mxu1  ;;  %v544_v52 = vadd.f32 %v543_v13, %v376_v21 }
  0xdb   :  { %v1468_v23 = vpop.f32.mrf.mxu0 }
  0xdc   :  { %v1988_v24 = vpop.f32.mrf.mxu1  ;;  %v565_v61 = vadd.f32 %v1486_v16, %v1468_v23 }
  0xdd   :  { %v389_v33 = vpop.f32.mrf.mxu0 }
  0xde   :  { %v1990_v25 = vpop.f32.mrf.mxu1  ;;  %v557_v1 = vadd.f32 %v556_v18, %v389_v33 }
  0xdf   :  { %v1469_v26 = vpop.f32.mrf.mxu0 }
  0xe0   :  { %v1992_v28 = vpop.f32.mrf.mxu1  ;;  %v568_v7 = vadd.f32 %v1487_v20, %v1469_v26 }
  0xe1   :  { %v392_v27 = vpop.f32.mrf.mxu0 }
  0xe2   :  { %v1996_v29 = vpop.f32.mrf.mxu1  ;;  %v560_v14 = vadd.f32 %v559_v22, %v392_v27 }
  0xe5   :  { %v1994_v15 = vpop.f32.mrf.mxu0 }
  0xe6   :  { %v2002_v32 = vpop.f32.mrf.mxu1  ;;  %v581_v20 = vadd.f32 %v1988_v24, %v1994_v15 }
  0xe7   :  { %v1998_v30 = vpop.f32.mrf.mxu0 }
  0xe8   :  { %v2006_v35 = vpop.f32.mrf.mxu1  ;;  %v573_v27 = vadd.f32 %v1990_v25, %v1998_v30 }
  0xe9   :  { %v2000_v31 = vpop.f32.mrf.mxu0 }
  0xea   :  { %v2012_v38 = vpop.f32.mrf.mxu1 }
  0xeb   :  { %v2004_v34 = vpop.f32.mrf.mxu0 }
  0xec   :  { %v2018_v42 = vpop.f32.mrf.mxu1 }
  0xef   :  { %v2008_v36 = vpop.f32.mrf.mxu0 }
  0xf1   :  { %v2010_v37 = vpop.f32.mrf.mxu0 }
  0xf3   :  { %v2014_v39 = vpop.f32.mrf.mxu0 }
  0xf5   :  { %v2016_v40 = vpop.f32.mrf.mxu0 }
  0xf7   :  { %v1500_v43 = vpop.f32.mrf.mxu0 }
  0xf8   :  { %v791_v45 = vadd.f32 %v1500_v43, %v549_v41 }
  0xf9   :  { %v726_v46 = vpop.f32.mrf.mxu0 }
  0xfa   :  { %v1518_v48 = vpop.f32.mrf.mxu1  ;;  %v789_v49 = vadd.f32 %v726_v46, %v541_v44 }
  0xfb   :  { %v1217_v50 = vadd.f32 %v1518_v48, %v791_v45  ;;  %v1501_v51 = vpop.f32.mrf.mxu0 }
  0xfc   :  { %v1152_v53 = vpop.f32.mrf.mxu1  ;;  %v792_v54 = vadd.f32 %v1501_v51, %v552_v47 }
  0xfd   :  { %1233 = vst [vmem:[#allocation2 + $0x10] sm:$0xff] %v1217_v50  ;;  %v1215_v55 = vadd.f32 %v1152_v53, %v789_v49  ;;  %v729_v56 = vpop.f32.mrf.mxu0  ;;  %v1271_v9 = vmul.f32 %v1217_v50, %v1217_v50  ;;  %v584_v53 = vadd.f32 %v1992_v28, %v2000_v31 }
  0xfe   :  { %v1519_v57 = vpop.f32.mrf.mxu1  ;;  %v790_v58 = vadd.f32 %v729_v56, %v544_v52 }
  0xff   :  { %1231 = vst [vmem:[#allocation2] sm:$0xff] %v1215_v55  ;;  %v1218_v59 = vadd.f32 %v1519_v57, %v792_v54  ;;  %v1504_v60 = vpop.f32.mrf.mxu0  ;;  %v1269_v3 = vmul.f32 %v1215_v55, %v1215_v55  ;;  %v576_v57 = vadd.f32 %v1996_v29, %v2004_v34 }
 0x100   :  { %v1155_v62 = vpop.f32.mrf.mxu1  ;;  %v795_v2 = vadd.f32 %v1504_v60, %v565_v61 }
 0x101   :  { %1234 = vst [vmem:[#allocation2 + $0x18] sm:$0xff] %v1218_v59  ;;  %v1216_v63 = vadd.f32 %v1155_v62, %v790_v58  ;;  %v742_v0 = vpop.f32.mrf.mxu0  ;;  %v1272_v19 = vmul.f32 %v1218_v59, %v1218_v59 }
 0x102   :  { %v793_v8 = vadd.f32 %v742_v0, %v557_v1 }
 0x103   :  { %1232 = vst [vmem:[#allocation2 + $0x8] sm:$0xff] %v1216_v63  ;;  %v1247_v4 = vadd.f32 %v1216_v63, %v1215_v55  ;;  %v1270_v5 = vmul.f32 %v1216_v63, %v1216_v63  ;;  %v1505_v6 = vpop.f32.mrf.mxu0 }
 0x104   :  { %v796_v17 = vadd.f32 %v1505_v6, %v568_v7 }
 0x105   :  { %v1522_v10 = vpop.f32.mrf.mxu1  ;;  %v1248_v11 = vadd.f32 %v1247_v4, %v1217_v50  ;;  %v1285_v12 = vadd.f32 %v1270_v5, %v1269_v3  ;;  %v745_v13 = vpop.f32.mrf.mxu0  ;;  %v597_v4 = vadd.f32 %v2002_v32, %v2008_v36 }
 0x106   :  { %v1221_v16 = vadd.f32 %v1522_v10, %v795_v2  ;;  %v794_v43 = vadd.f32 %v745_v13, %v560_v14  ;;  %v600_v13 = vadd.f32 %v2012_v38, %v2014_v39 }
 0x107   :  { %v1286_v21 = vadd.f32 %v1285_v12, %v1271_v9  ;;  %v1168_v23 = vpop.f32.mrf.mxu1  ;;  %v1249_v18 = vadd.f32 %v1248_v11, %v1218_v59  ;;  %v1508_v33 = vpop.f32.mrf.mxu0  ;;  %v589_v9 = vadd.f32 %v2006_v35, %v2010_v37 }
 0x108   :  { %1237 = vst [vmem:[#allocation2 + $0x30] sm:$0xff] %v1221_v16  ;;  %v1219_v41 = vadd.f32 %v1168_v23, %v793_v8  ;;  %v799_v49 = vadd.f32 %v1508_v33, %v581_v20  ;;  %v1275_v59 = vmul.f32 %v1221_v16, %v1221_v16 }
 0x109   :  { %v1523_v26 = vpop.f32.mrf.mxu1  ;;  %v1287_v44 = vadd.f32 %v1286_v21, %v1272_v19  ;;  %v758_v45 = vpop.f32.mrf.mxu0 }
 0x10a   :  { %1235 = vst [vmem:[#allocation2 + $0x20] sm:$0xff] %v1219_v41  ;;  %v1250_v46 = vadd.f32 %v1249_v18, %v1219_v41  ;;  %v1273_v47 = vmul.f32 %v1219_v41, %v1219_v41  ;;  %v1222_v22 = vadd.f32 %v1523_v26, %v796_v17  ;;  %v797_v24 = vadd.f32 %v758_v45, %v573_v27 }
 0x10b   :  { %v1171_v48 = vpop.f32.mrf.mxu1  ;;  %v1509_v50 = vpop.f32.mrf.mxu0 }
 0x10c   :  { %v1288_v51 = vadd.f32 %v1287_v44, %v1273_v47  ;;  %1238 = vst [vmem:[#allocation2 + $0x38] sm:$0xff] %v1222_v22  ;;  %v1220_v52 = vadd.f32 %v1171_v48, %v794_v43  ;;  %v800_v25 = vadd.f32 %v1509_v50, %v584_v53  ;;  %v1276_v31 = vmul.f32 %v1222_v22, %v1222_v22 }
 0x10d   :  { %v761_v15 = vpop.f32.mrf.mxu0 }
 0x10e   :  { %v1526_v54 = vpop.f32.mrf.mxu1  ;;  %1236 = vst [vmem:[#allocation2 + $0x28] sm:$0xff] %v1220_v52  ;;  %v1251_v55 = vadd.f32 %v1250_v46, %v1220_v52  ;;  %v1274_v56 = vmul.f32 %v1220_v52, %v1220_v52  ;;  %v798_v0 = vadd.f32 %v761_v15, %v576_v57 }
 0x10f   :  { %v1225_v58 = vadd.f32 %v1526_v54, %v799_v49  ;;  %v1512_v30 = vpop.f32.mrf.mxu0 }
 0x110   :  { %v1252_v60 = vadd.f32 %v1251_v55, %v1221_v16  ;;  %v1289_v61 = vadd.f32 %v1288_v51, %v1274_v56  ;;  %v1184_v62 = vpop.f32.mrf.mxu1  ;;  %v803_v11 = vadd.f32 %v1512_v30, %v597_v4  ;;  %v592_v16 = vadd.f32 %v2018_v42, %v2016_v40 }
 0x111   :  { %1241 = vst [vmem:[#allocation2 + $0x50] sm:$0xff] %v1225_v58  ;;  %v1223_v63 = vadd.f32 %v1184_v62, %v797_v24  ;;  %v774_v28 = vpop.f32.mrf.mxu0  ;;  %v1279_v17 = vmul.f32 %v1225_v58, %v1225_v58 }
 0x112   :  { %v1290_v1 = vadd.f32 %v1289_v61, %v1275_v59  ;;  %v1527_v2 = vpop.f32.mrf.mxu1  ;;  %v1253_v3 = vadd.f32 %v1252_v60, %v1222_v22  ;;  %v801_v36 = vadd.f32 %v774_v28, %v589_v9 }
 0x113   :  { %1239 = vst [vmem:[#allocation2 + $0x40] sm:$0xff] %v1223_v63  ;;  %v1226_v29 = vadd.f32 %v1527_v2, %v800_v25  ;;  %v1277_v5 = vmul.f32 %v1223_v63, %v1223_v63  ;;  %v1513_v8 = vpop.f32.mrf.mxu0 }
 0x114   :  { %v1254_v34 = vadd.f32 %v1253_v3, %v1223_v63  ;;  %v1291_v6 = vadd.f32 %v1290_v1, %v1276_v31  ;;  %v1187_v7 = vpop.f32.mrf.mxu1  ;;  %v804_v37 = vadd.f32 %v1513_v8, %v600_v13 }
 0x115   :  { %1242 = vst [vmem:[#allocation2 + $0x58] sm:$0xff] %v1226_v29  ;;  %v1224_v10 = vadd.f32 %v1187_v7, %v798_v0  ;;  %v777_v21 = vpop.f32.mrf.mxu0  ;;  %v1280_v33 = vmul.f32 %v1226_v29, %v1226_v29 }
 0x116   :  { %v1292_v12 = vadd.f32 %v1291_v6, %v1277_v5  ;;  %v802_v39 = vadd.f32 %v777_v21, %v592_v16 }
 0x117   :  { %1240 = vst [vmem:[#allocation2 + $0x48] sm:$0xff] %v1224_v10  ;;  %v1255_v14 = vadd.f32 %v1254_v34, %v1224_v10  ;;  %v1278_v32 = vmul.f32 %v1224_v10, %v1224_v10 }
 0x118   :  { %v1530_v19 = vpop.f32.mrf.mxu1 }
 0x119   :  { %v1256_v23 = vadd.f32 %v1255_v14, %v1225_v58  ;;  %v1293_v18 = vadd.f32 %v1292_v12, %v1278_v32  ;;  %v1229_v35 = vadd.f32 %v1530_v19, %v803_v11 }
 0x11a   :  { %v1200_v41 = vpop.f32.mrf.mxu1 }
 0x11b   :  { %v1294_v43 = vadd.f32 %v1293_v18, %v1279_v17  ;;  %1245 = vst [vmem:[#allocation2 + $0x70] sm:$0xff] %v1229_v35  ;;  %v1227_v20 = vadd.f32 %v1200_v41, %v801_v36  ;;  %v1257_v38 = vadd.f32 %v1256_v23, %v1226_v29 }
 0x11c   :  { %v1531_v26 = vpop.f32.mrf.mxu1 }
 0x11d   :  { %1243 = vst [vmem:[#allocation2 + $0x60] sm:$0xff] %v1227_v20  ;;  %v1258_v44 = vadd.f32 %v1257_v38, %v1227_v20  ;;  %v1281_v40 = vmul.f32 %v1227_v20, %v1227_v20  ;;  %v1295_v42 = vadd.f32 %v1294_v43, %v1280_v33  ;;  %v1230_v45 = vadd.f32 %v1531_v26, %v804_v37 }
 0x11e   :  { %v1203_v46 = vpop.f32.mrf.mxu1 }
 0x11f   :  { %v1296_v47 = vadd.f32 %v1295_v42, %v1281_v40  ;;  %1246 = vst [vmem:[#allocation2 + $0x78] sm:$0xff] %v1230_v45  ;;  %v1228_v22 = vadd.f32 %v1203_v46, %v802_v39 }
 0x121   :  { %1244 = vst [vmem:[#allocation2 + $0x68] sm:$0xff] %v1228_v22  ;;  %v1259_v27 = vadd.f32 %v1258_v44, %v1228_v22  ;;  %v1282_v48 = vmul.f32 %v1228_v22, %v1228_v22 }
 0x122   :  { %1568 = shalt.err (!%p1565_p4)
}
 0x123   :  { %s1622_s14 = smov 128   ;;  %s1623_s0 = smov 8   ;;  %v1283_v49 = vmul.f32 %v1229_v35, %v1229_v35  ;;  %v1260_v50 = vadd.f32 %v1259_v27, %v1229_v35  ;;  %v1297_v51 = vadd.f32 %v1296_v47, %v1282_v48  ;;  %v1284_v52 = vmul.f32 %v1230_v45, %v1230_v45 }
 0x124   :  { %1318 = dma.vmem_to_hbm [thread:$0]  %s1313_s12, 2048, %s2048_s3, [#allocation3], %s1622_s14, %s1622_s14, %s1623_s0  }
 0x125   :  { %v1261_v53 = vadd.f32 %v1260_v50, %v1230_v45  ;;  %v1298_v24 = vadd.f32 %v1297_v51, %v1283_v49  ;;  %s1624_s2 = smov [#allocation4]   ;;  %s1625_s18 = smov [#allocation6]  }
 0x126   :  { %s1325_s17 = sshll.u32 %s1624_s2, 4  ;;  %s1335_s3 = sshll.u32 %s1625_s18, 4  ;;  %s1326_s17 = int_to_ptr.vmem [resolvable:$true] %s1325_s17  ;;  %s1336_s3 = int_to_ptr.vmem [resolvable:$true] %s1335_s3 }
 0x127   :  { %v1262_v15 = vrot.slane %v1261_v53, 4  ;;  %v1299_v54 = vadd.f32 %v1298_v24, %v1284_v52  ;;  %s1577_s19 = scalar_lea.vmem %s1326_s17, 16  ;;  %s1581_s20 = scalar_lea.vmem %s1326_s17, 32 }
 0x128   :  { %p1578_p5 = scmp.ne.s32.totalorder %s1326_s17, %s1577_s19  ;;  %p1582_p6 = scmp.lt.s32.totalorder %s1326_s17, %s1326_s17 }
 0x129   :  { %v1263_v55 = vadd.f32 %v1262_v15, %v1261_v53  ;;  %v1300_v56 = vrot.slane %v1299_v54, 4  ;;  %p1583_p7 = scmp.lt.s32.totalorder %s1581_s20, %s1577_s19 }
 0x12b   :  { %v1264_v57 = vrot.slane %v1263_v55, 2  ;;  %v1301_v58 = vadd.f32 %v1300_v56, %v1299_v54  ;;  %p1584_p8 = por %p1583_p7, %p1582_p6 }
 0x12d   :  { %v1265_v25 = vadd.f32 %v1264_v57, %v1263_v55  ;;  %v1302_v30 = vrot.slane %v1301_v58, 2  ;;  %p1585_p9 = pnand %p1584_p8, %p1578_p5 }
 0x12f   :  { %v1266_v59 = vrot.slane %v1265_v25, 1  ;;  %v1303_v60 = vadd.f32 %v1302_v30, %v1301_v58 }
 0x131   :  { %v1267_v61 = vadd.f32 %v1266_v59, %v1265_v25  ;;  %v1304_v62 = vrot.slane %v1303_v60, 1 }
 0x133   :  { %1268 = vst [vmem:[#allocation4] sm:$0x1] %v1267_v61  ;;  %v1305_v63 = vadd.f32 %v1304_v62, %v1303_v60 }
 0x134   :  { %1588 = shalt.err (!%p1585_p9)
}
 0x135   :  { %1328 = dma.vmem_to_hbm [thread:$0]  %s1326_s17, 16, %s2049_s4, [#allocation5]   ;;  %1306 = vst [vmem:[#allocation6] sm:$0x1] %v1305_v63 }
 0x136   :  { %s1597_s23 = scalar_lea.vmem %s1336_s3, 16  ;;  %s1601_s24 = scalar_lea.vmem %s1336_s3, 32 }
 0x137   :  { %p1598_p10 = scmp.ne.s32.totalorder %s1336_s3, %s1597_s23  ;;  %p1602_p11 = scmp.lt.s32.totalorder %s1336_s3, %s1336_s3 }
 0x138   :  { %p1603_p12 = scmp.lt.s32.totalorder %s1601_s24, %s1597_s23 }
 0x13a   :  { %p1604_p13 = por %p1603_p12, %p1602_p11 }
 0x13c   :  { %p1605_p0 = pnand %p1604_p13, %p1598_p10 }
 0x13e   :  { %1608 = shalt.err (!%p1605_p0)
}
 0x13f   :  { %1338 = dma.vmem_to_hbm [thread:$0]  %s1336_s3, 16, %s2050_s5, [#allocation5]  }
 0x140   :  { %1617 = dma.done.wait [#allocation3], 2048  }
 0x141   :  { %1618 = vsyncadd [#allocation3], 4294965248 }
 0x142   :  { %1619 = dma.done.wait [#allocation5], 32  }
 0x143   :  { %1620 = vsyncadd [#allocation5], 4294967264 }
 0x144   :  { %1348 = vsyncpa [#allocation3], 1 }
 0x145   :  { %1349 = vsyncpa [#allocation5], 1 }

</bundles_post_ra>
